<compile_context>
chip_gen: v7x
topology: tpu7x:2x2x1
jax: 0.10.0
libtpu: 0.0.40
codegen_flags: <defaults>
</compile_context>

<pallas_src>
import functools

import jax
import jax.numpy as jnp
from jax.experimental import pallas as pl
from jax.experimental.pallas import tpu as pltpu


_REDUCE_TILE_BYTES = 8 << 20     # per pipeline buffer; 2 streams x 2 buffers
_PIXELWISE_TILE_BYTES = 6 << 20  # per pipeline buffer; 3 streams x 2 buffers
_MIN_PARALLEL_BLOCKS = 2         # keep both v7x TensorCores streaming HBM


# ----------------------------------------------------------------------------
# Tile planning
# ----------------------------------------------------------------------------

def _sublane_pack(itemsize):
    # vreg sublane packing: 8 rows for 4-byte, 16 for 2-byte, 32 for 1-byte.
    return max(8, 32 // max(1, itemsize))


def _row_tile(N, M, itemsize, budget_bytes, sublane, min_parallel):
    """Rows per block: as many full-width rows as fit the per-buffer budget,
    rounded to the dtype sublane pack, and capped so the row axis keeps at
    least `min_parallel` blocks whenever N is large enough to allow it."""
    rows_fit = max(1, budget_bytes // max(1, M * itemsize))
    if rows_fit >= N:
        if min_parallel > 1 and N >= min_parallel * sublane:
            return max(sublane, (((N + 1) // 2) // sublane) * sublane)
        return N
    if N <= sublane:
        return N                       # must equal the full dim (8,128 rule)
    return min(N, max(sublane, (rows_fit // sublane) * sublane))


def _col_tile(M, row_tile, itemsize, budget_bytes):
    cols_fit = max(1, budget_bytes // max(1, row_tile * itemsize))
    if cols_fit >= M:
        return M
    return min(M, max(128, (cols_fit // 128) * 128))


def _plan_reduction(N, M, itemsize, budget_bytes, min_parallel):
    sublane = _sublane_pack(itemsize)
    budget_bytes = max(budget_bytes, sublane * 128 * itemsize)
    row_tile = _row_tile(N, M, itemsize, budget_bytes, sublane, min_parallel)
    col_tile = _col_tile(M, row_tile, itemsize, budget_bytes)

    col_groups = 1
    if min_parallel > 1 and pl.cdiv(N, row_tile) < min_parallel and M > 128:
        # Tiny batch: the row axis cannot feed both TensorCores, so split the
        # flat column axis into independent partial-sum groups instead.
        split = pl.cdiv(pl.cdiv(M, min_parallel), 128) * 128
        col_tile = min(col_tile, max(128, split))
        col_groups = min(min_parallel, pl.cdiv(M, col_tile))

    total_chunks = pl.cdiv(M, col_tile)
    chunks_per_group = pl.cdiv(total_chunks, col_groups)
    return row_tile, col_tile, col_groups, chunks_per_group


def _plan_pixelwise(N, M, itemsize, budget_bytes, min_parallel):
    sublane = _sublane_pack(itemsize)
    budget_bytes = max(budget_bytes, sublane * 128 * itemsize)
    row_tile = _row_tile(N, M, itemsize, budget_bytes, sublane, min_parallel)
    col_tile = _col_tile(M, row_tile, itemsize, budget_bytes)
    if (min_parallel > 1
            and pl.cdiv(N, row_tile) * pl.cdiv(M, col_tile) < min_parallel
            and M >= min_parallel * 128):
        split = pl.cdiv(pl.cdiv(M, min_parallel), 128) * 128
        col_tile = min(col_tile, max(128, split))
    # else: array too small for a second lane/sublane-aligned block.
    return row_tile, col_tile


# ----------------------------------------------------------------------------
# Kernels
# ----------------------------------------------------------------------------

def _pixelwise_kernel(x_ref, y_ref, o_ref):
    # Pure elementwise |x - y| on a lane-dense (row_tile, col_tile) tile.
    o_ref[...] = jnp.abs(x_ref[...] - y_ref[...])


def _persample_sum_kernel(x_ref, y_ref, o_ref, *, n_cols, col_tile,
                          chunks_per_group, needs_mask, upcast):
    """Accumulate per-sample sum(|x - y|) over column chunks into the resident
    (1, row_tile, 1) f32 output block for this (row block, column group)."""
    g = pl.program_id(1)   # parallel column group
    k = pl.program_id(2)   # reduction chunk within the group (innermost)

    @pl.when(k == 0)
    def _init():
        o_ref[...] = jnp.zeros_like(o_ref)

    x = x_ref[...]
    y = y_ref[...]
    if upcast:  # fp16 difference can overflow; bf16/f32 are safe natively.
        x = x.astype(jnp.float32)
        y = y.astype(jnp.float32)

    def _accumulate(mask_tail):
        d = jnp.abs(x - y)
        if mask_tail:
            c = g * chunks_per_group + k
            col = jax.lax.broadcasted_iota(jnp.int32, d.shape, 1) + c * col_tile
            d = jnp.where(col < n_cols, d, jnp.zeros_like(d))
        o_ref[...] += jnp.sum(d, axis=1, keepdims=True,
                              dtype=jnp.float32)[None]

    if not needs_mask:
        _accumulate(False)
    else:
        # Only pay the iota/compare/select on chunks that overhang n_cols;
        # steady-state chunks run the unmasked fast path.
        c = g * chunks_per_group + k
        is_tail = (c + 1) * col_tile > n_cols

        @pl.when(jnp.logical_not(is_tail))
        def _full():
            _accumulate(False)

        @pl.when(is_tail)
        def _tail():
            _accumulate(True)


# ----------------------------------------------------------------------------
# Wrapper
# ----------------------------------------------------------------------------

def l1_loss(x, y, reduction="none", *, tile_budget_bytes=None,
            min_parallel_blocks=_MIN_PARALLEL_BLOCKS):
    assert reduction in ["none", "sum", "mean", "pixelwise"]
    assert x.ndim == 4 and x.shape == y.shape and x.dtype == y.dtype
    N, C, H, W = x.shape
    M = C * H * W
    itemsize = jnp.dtype(x.dtype).itemsize

    # Free reshapes: NCHW is contiguous, so (N, C*H*W) is just a new view.
    x2 = x.reshape(N, M)
    y2 = y.reshape(N, M)

    if reduction == "pixelwise":
        budget = tile_budget_bytes or _PIXELWISE_TILE_BYTES
        row_tile, col_tile = _plan_pixelwise(
            N, M, itemsize, budget, min_parallel_blocks)
        grid = (pl.cdiv(N, row_tile), pl.cdiv(M, col_tile))
        block_bytes = row_tile * col_tile * itemsize
        spec = pl.BlockSpec((row_tile, col_tile), lambda i, j: (i, j))
        out2 = pl.pallas_call(
            _pixelwise_kernel,
            out_shape=jax.ShapeDtypeStruct((N, M), x.dtype),
            grid=grid,
            in_specs=[spec, spec],
            out_specs=spec,
            compiler_params=pltpu.CompilerParams(
                dimension_semantics=("parallel", "parallel"),
                vmem_limit_bytes=int(6 * block_bytes + (4 << 20))),
            cost_estimate=pl.CostEstimate(
                flops=2 * N * M, transcendentals=0,
                bytes_accessed=3 * N * M * itemsize),
        )(x2, y2)
        return out2.reshape(N, C, H, W)

    # ---- per-sample-mean reduction path ----
    budget = tile_budget_bytes or _REDUCE_TILE_BYTES
    row_tile, col_tile, col_groups, chunks_per_group = _plan_reduction(
        N, M, itemsize, budget, min_parallel_blocks)
    grid = (pl.cdiv(N, row_tile), col_groups, chunks_per_group)

    total_chunks = pl.cdiv(M, col_tile)
    last_chunk = total_chunks - 1
    padded_chunks = col_groups * chunks_per_group
    needs_mask = padded_chunks * col_tile != M
    clamp_chunk = padded_chunks > total_chunks   # padding-only chunks exist

    def in_map(i, g, k):
        c = g * chunks_per_group + k
        if clamp_chunk:
            # Padding-only chunks re-read the last real chunk (in-bounds DMA);
            # the kernel's tail mask zeroes their contribution.
            c = jnp.minimum(c, last_chunk)
        return (i, c)

    in_spec = pl.BlockSpec((row_tile, col_tile), in_map)
    out_spec = pl.BlockSpec((1, row_tile, 1), lambda i, g, k: (g, i, 0))

    kernel = functools.partial(
        _persample_sum_kernel,
        n_cols=M, col_tile=col_tile, chunks_per_group=chunks_per_group,
        needs_mask=needs_mask,
        upcast=(jnp.dtype(x.dtype) == jnp.dtype(jnp.float16)))

    block_bytes = row_tile * col_tile * itemsize
    partials = pl.pallas_call(
        kernel,
        out_shape=jax.ShapeDtypeStruct((col_groups, N, 1), jnp.float32),
        grid=grid,
        in_specs=[in_spec, in_spec],
        out_specs=out_spec,
        compiler_params=pltpu.CompilerParams(
            dimension_semantics=("parallel", "parallel", "arbitrary"),
            vmem_limit_bytes=int(4 * block_bytes + (4 << 20))),
        cost_estimate=pl.CostEstimate(
            flops=3 * N * M, transcendentals=0,
            bytes_accessed=2 * N * M * itemsize + 4 * N * col_groups),
    )(x2, y2)

    # Combine the (<= 2) column-group partial sums and normalize, all in f32.
    per_sample = jnp.sum(partials.reshape(col_groups, N), axis=0) / jnp.float32(M)

    if reduction == "none":
        return per_sample.astype(x.dtype)
    elif reduction == "mean":
        return jnp.mean(per_sample).astype(x.dtype)   # batch reduce in f32
    else:  # "sum"
        return jnp.sum(per_sample).astype(x.dtype)    # batch reduce in f32


class L1Loss:
    """JAX/Pallas port of the reference PyTorch L1Loss module."""

    def __init__(self, reduction="none"):
        assert reduction in ["none", "sum", "mean", "pixelwise"]
        self._reduction = reduction

    def set_reduction(self, reduction):
        assert reduction in ["none", "sum", "mean", "pixelwise"]
        self._reduction = reduction

    def __call__(self, x, y):
        return l1_loss(x, y, self._reduction)


# ----------------------------------------------------------------------------
# Reference + tests
# ----------------------------------------------------------------------------

def _reference(x, y, reduction):
    losses = jnp.abs(x - y)
    if reduction == "pixelwise":
        return losses
    denom = losses.shape[1] * losses.shape[2] * losses.shape[3]
    per_sample = losses.astype(jnp.float32).sum(axis=(1, 2, 3)) / denom
    if reduction == "none":
        return per_sample.astype(x.dtype)
    elif reduction == "mean":
        return jnp.mean(per_sample).astype(x.dtype)
    return jnp.sum(per_sample).astype(x.dtype)


if __name__ == "__main__":
    key = jax.random.PRNGKey(0)
    kx, ky = jax.random.split(key)

    # Primary small test shape (lane-aligned: C*H*W = 1024). With N=2 the
    # reduction path exercises the column-group partial-sum split.
    N, C, H, W = 2, 4, 16, 16
    x = jax.random.normal(kx, (N, C, H, W), dtype=jnp.float32)
    y = jax.random.normal(ky, (N, C, H, W), dtype=jnp.float32)

    loss_mod = L1Loss()
    for red in ["pixelwise", "none", "mean", "sum"]:
        loss_mod.set_reduction(red)
        out = jax.block_until_ready(loss_mod(x, y))
        ref = _reference(x, y, red)
        assert out.shape == ref.shape, (red, out.shape, ref.shape)
        assert jnp.allclose(out, ref, rtol=1e-5, atol=1e-5), red

    # Odd, non-128-aligned shape with a tiny tile budget to exercise the
    # chunked-column, column-group, masked-tail and clamped-padding paths.
    N2, C2, H2, W2 = 3, 3, 17, 23
    x2 = jax.random.normal(kx, (N2, C2, H2, W2), dtype=jnp.float32)
    y2 = jax.random.normal(ky, (N2, C2, H2, W2), dtype=jnp.float32)
    for red in ["pixelwise", "none", "mean", "sum"]:
        out = jax.block_until_ready(
            l1_loss(x2, y2, red, tile_budget_bytes=4 * 1024))
        ref = _reference(x2, y2, red)
        assert out.shape == ref.shape, (red, out.shape, ref.shape)
        assert jnp.allclose(out, ref, rtol=1e-5, atol=1e-5), red

    # bf16 smoke test (exercises the 16-row sublane-pack planning).
    xb = x.astype(jnp.bfloat16)
    yb = y.astype(jnp.bfloat16)
    for red in ["none", "mean"]:
        out = jax.block_until_ready(l1_loss(xb, yb, red))
        ref = _reference(xb, yb, red)
        assert out.shape == ref.shape, (red, out.shape, ref.shape)
        assert jnp.allclose(out.astype(jnp.float32), ref.astype(jnp.float32),
                            rtol=2e-2, atol=2e-2), red

    print("KERNEL_OK")
</pallas_src>

<mosaic_0001>
module attributes {stable_mosaic.version = 11 : i64} {
  func.func @_pixelwise_kernel(%arg0: i32, %arg1: i32, %arg2: memref<2x512xf32, #tpu.memory_space<vmem>>, %arg3: memref<2x512xf32, #tpu.memory_space<vmem>>, %arg4: memref<2x512xf32, #tpu.memory_space<vmem>>) attributes {dimension_semantics = [#tpu.dimension_semantics<parallel>, #tpu.dimension_semantics<parallel>], iteration_bounds = array<i64: 1, 2>, scalar_prefetch = 0 : i64, scratch_operands = 0 : i64, tpu.core_type = #tpu.core_type<tc>, window_params = [{transform_indices = @transform_0, window_bounds = array<i64: 2, 512>}, {transform_indices = @transform_1, window_bounds = array<i64: 2, 512>}, {transform_indices = @transform_2, window_bounds = array<i64: 2, 512>}]} {
    %c0 = arith.constant 0 : index
    %c0_0 = arith.constant 0 : index
    %0 = vector.load %arg2[%c0, %c0_0] : memref<2x512xf32, #tpu.memory_space<vmem>>, vector<2x512xf32>
    %c0_1 = arith.constant 0 : index
    %c0_2 = arith.constant 0 : index
    %1 = vector.load %arg3[%c0_1, %c0_2] : memref<2x512xf32, #tpu.memory_space<vmem>>, vector<2x512xf32>
    %2 = arith.subf %0, %1 : vector<2x512xf32>
    %3 = math.absf %2 : vector<2x512xf32>
    %c0_3 = arith.constant 0 : index
    %c0_4 = arith.constant 0 : index
    %4 = vector.load %arg4[%c0_3, %c0_4] : memref<2x512xf32, #tpu.memory_space<vmem>>, vector<2x512xf32>
    tpu.vector_store %arg4[%c0_3, %c0_4], %3 {strides = array<i32>} : memref<2x512xf32, #tpu.memory_space<vmem>>, vector<2x512xf32>,
    return
  }
  func.func @transform_0(%arg0: i32, %arg1: i32) -> (i32, i32) {
    %c0_i32 = arith.constant 0 : i32
    return %arg0, %arg1 : i32, i32
  }
  func.func @transform_1(%arg0: i32, %arg1: i32) -> (i32, i32) {
    %c0_i32 = arith.constant 0 : i32
    return %arg0, %arg1 : i32, i32
  }
  func.func @transform_2(%arg0: i32, %arg1: i32) -> (i32, i32) {
    %c0_i32 = arith.constant 0 : i32
    return %arg0, %arg1 : i32, i32
  }
}

</mosaic_0001>

<bundles_post_ra>
// kernel: tpu_custom_call.1
= control target key start
LH: loop header
LB: loop body
LE: loop exit
PB: predicated region body
PF: predicated region fallthrough
CT: control target
= control target key end

     0   :  { %7 = vsyncpa [#allocation3], 0  ;;  %s830_s0 = inlined_call_operand.hbm [shape: f32[2,1024], index: 0, kind: input, shape index: {}]   ;;  %s831_s1 = inlined_call_operand.hbm [shape: f32[2,1024], index: 1, kind: input, shape index: {}]   ;;  %s832_s2 = inlined_call_operand.hbm [shape: f32[2,1024], index: 2, kind: output, shape index: {}]  }
   0x1   :  { %9 = vsyncpa [#allocation3 + $0x1], 0 }
   0x2   :  { %10 = vsyncpa [#allocation6], 0 }
   0x3   :  { %12 = vsyncpa [#allocation6 + $0x1], 0 }
   0x4   :  { %13 = vsyncpa [#allocation4], 0 }
   0x5   :  { %15 = vsyncpa [#allocation4 + $0x1], 0  ;;  %s610_s9 = smov 0   ;;  %s612_s10 = smov 0  }
   0x6   :  { %s614_s11 = smov 0   ;;  %s616_s12 = smov 0  }
   0x7   :  { %s618_s13 = smov 0   ;;  %s620_s14 = smov 0  }
   0x8 LB: > { %s355_s15 = sadd.s32 4294967295, %s590_s14   ;;  %s356_s16 = sadd.s32 4294967294, %s590_s14   ;;  %s590_s14 = sphi %s620_s14, %s21_s14   ;;  %s586_s13 = sphi %s618_s13, %s852_s13   ;;  %s582_s12 = sphi %s616_s12, %s851_s12   ;;  %s578_s11 = sphi %s614_s11, %s850_s11   ;;  %s574_s10 = sphi %s612_s10, %s849_s10   ;;  %s570_s9 = sphi %s610_s9, %s848_s9  }
   0x9   : > { %s30_s17 = sadd.s32 1, %s586_s13  ;;  %s42_s18 = sadd.s32 1, %s578_s11 }
   0xa   : > { %p31_p0 = scmp.ge.s32.totalorder %s30_s17, 2  ;;  %p49_p1 = scmp.ne.s32.totalorder %s578_s11, %s574_s10 }
   0xb   : > { %p50_p2 = scmp.eq.s32.totalorder %s590_s14, 0  ;;  %p55_p3 = scmp.ne.s32.totalorder %s574_s10, %s570_s9 }
   0xc   : > { %s854_s17 = smov (%p31_p0, %s30_s17), 0  ;;  %p56_p5 = scmp.eq.s32.totalorder %s355_s15, 0 }
   0xd   : > { %p651_p4 = por %p50_p2, %p49_p1  ;;  %s38_s20 = ssub.s32 %s586_s13, %s854_s17 }
   0xe   : > { %p109_p6 = scmp.eq.s32.totalorder %s355_s15, 1  ;;  %p40_p7 = scmp.eq.s32.totalorder %s38_s20, 0 }
   0xf   : > { %p657_p8 = por %p56_p5, %p55_p3  ;;  %p115_p10 = scmp.eq.s32.totalorder %s356_s16, 1 }
  0x10   : > { %p661_p9 = por %p109_p6, %p49_p1  ;;  %p394_p13 = scmp.lt.s32.totalorder %s590_s14, 2 }
  0x11   : > { %s836_s21 = scalar_select %p657_p8, 1, 0 }
  0x12   : > { %s837_s22 = scalar_select %p661_p9, 1, 0 }
  0x13   : > { %s666_s23 = scalar_select %p40_p7, %s578_s11, %s42_s18  }
  0x14   : > { %p668_p11 = por %p115_p10, %p55_p3  ;;  %s675_s25 = sand.u32 1, %s578_s11  }
  0x15   : > { %s359_s26 = sshll.u32 %s675_s25, 3  ;;  %s374_s27 = sshll.u32 %s586_s13, 7 }
  0x16   : > { %s838_s24 = scalar_select %p668_p11, 1, 0 }
  0x17   : > { %s684_s30 = scalar_lea.hbm %s830_s0, %s374_s27  ;;  %s139_s3 = scalar_lea.vmem [#allocation2], %s359_s26 }
  0x18   : > { %s149_s4 = sshll.u32 %s139_s3, 4  ;;  %p692_p0 = pnand %p394_p13, %p651_p4  ;;  %s688_s4 = int_to_ptr.vmem [resolvable:$true] %s149_s4 }
  0x19   : > { %s136_s6 = scalar_lea.sflag [#allocation3], %s675_s25  ;;  %s444_s7 = scalar_lea.hbm %s684_s30, 128 }
  0x1a   : > { %p445_p3 = scmp.ne.s32.totalorder %s684_s30, %s444_s7  ;;  %p446_p5 = pneg %p692_p0 }
  0x1b   : > { %s449_s16 = scalar_lea.hbm %s830_s0, 256  ;;  %p450_p4 = scmp.lt.u32.totalorder %s684_s30, %s830_s0 }
  0x1c   : > { %p447_p6 = pnand %p446_p5, %p445_p3  ;;  %p451_p10 = scmp.lt.u32.totalorder %s449_s16, %s444_s7 }
  0x1d   : > { %p453_p12 = scmp.lt.u32.totalorder %s444_s7, %s684_s30 }
  0x1e   : > { %p448_p7 = pneg %p447_p6  ;;  %p452_p13 = por %p451_p10, %p450_p4 }
  0x20   : > { %p454_p1 = por %p453_p12, %p452_p13 }
  0x22   : > { %p455_p2 = pnand %p454_p1, %p448_p7 }
  0x24   : > { %458 = shalt.err (!%p455_p2)
}
  0x25   : > { %s459_s20 = scalar_lea.vmem %s688_s4, 128  ;;  %s592_s28 = smov [#allocation2]  }
  0x26   : > { %p460_p3 = scmp.ne.s32.totalorder %s688_s4, %s459_s20  ;;  %s464_s29 = sshll.u32 %s592_s28, 4  ;;  %s465_s29 = int_to_ptr.vmem [resolvable:$false] %s464_s29 }
  0x27   : > { %s466_s3 = scalar_lea.vmem %s465_s29, 256  ;;  %p467_p9 = scmp.lt.s32.totalorder %s688_s4, %s465_s29 }
  0x28   : > { %p462_p6 = pnand %p460_p3, %p446_p5  ;;  %p468_p4 = scmp.lt.s32.totalorder %s466_s3, %s459_s20 }
  0x2a   : > { %p463_p11 = pneg %p462_p6  ;;  %p469_p10 = por %p468_p4, %p467_p9 }
  0x2c   : > { %p470_p12 = pnand %p469_p10, %p463_p11 }
  0x2e   : > { %473 = shalt.err (!%p470_p12)
}
  0x2f   : > { %386 = dma.hbm_to_vmem [thread:$0]  (!%p692_p0), %s684_s30, 128, %s688_s4, %s136_s6  }
  0x30   : > { %p840_p1 = scmp.lt.s32.totalorder %s590_s14, 3  ;;  %p841_p2 = scmp.ge.s32.totalorder %s590_s14, 1 }
  0x31   : > { %s737_s16 = scalar_lea.hbm %s831_s1, %s374_s27  ;;  %s160_s18 = scalar_lea.vmem [#allocation5], %s359_s26 }
  0x32   : > { %p728_p7 = pnand %p841_p2, %p840_p1  ;;  %s170_s19 = sshll.u32 %s160_s18, 4  ;;  %s171_s19 = int_to_ptr.vmem [resolvable:$true] %s170_s19 }
  0x33   : > { %s157_s30 = scalar_lea.sflag [#allocation6], %s675_s25  ;;  %s474_s4 = scalar_lea.hbm %s737_s16, 128 }
  0x34   : > { %s842_s7 = scalar_select %p728_p7, 1, 0 }
  0x35   : > { %p475_p9 = scmp.ne.s32.totalorder %s737_s16, %s474_s4  ;;  %s479_s27 = scalar_lea.hbm %s831_s1, 256 }
  0x36   : > { %p480_p3 = scmp.lt.u32.totalorder %s737_s16, %s831_s1  ;;  %p481_p6 = scmp.lt.u32.totalorder %s479_s27, %s474_s4 }
  0x37   : > { %p477_p11 = pnand %p475_p9, %p446_p5  ;;  %p483_p10 = scmp.lt.u32.totalorder %s474_s4, %s737_s16 }
  0x38   : > { %p482_p4 = por %p481_p6, %p480_p3 }
  0x39   : > { %p478_p13 = pneg %p477_p11 }
  0x3a   : > { %p484_p12 = por %p483_p10, %p482_p4 }
  0x3c   : > { %p485_p1 = pnand %p484_p12, %p478_p13 }
  0x3e   : > { %488 = shalt.err (!%p485_p1)
}
  0x3f   : > { %s489_s25 = scalar_lea.vmem %s171_s19, 128  ;;  %s593_s26 = smov [#allocation5]  }
  0x40   : > { %p490_p2 = scmp.ne.s32.totalorder %s171_s19, %s489_s25  ;;  %s494_s3 = sshll.u32 %s593_s26, 4  ;;  %s495_s3 = int_to_ptr.vmem [resolvable:$false] %s494_s3 }
  0x41   : > { %s496_s8 = scalar_lea.vmem %s495_s3, 256  ;;  %p497_p8 = scmp.lt.s32.totalorder %s171_s19, %s495_s3 }
  0x42   : > { %p492_p9 = pnand %p490_p2, %p446_p5  ;;  %p498_p7 = scmp.lt.s32.totalorder %s496_s8, %s489_s25 }
  0x44   : > { %p493_p11 = pneg %p492_p9  ;;  %p499_p3 = por %p498_p7, %p497_p8 }
  0x46   : > { %p500_p6 = pnand %p499_p3, %p493_p11 }
  0x48   : > { %503 = shalt.err (!%p500_p6)
}
  0x49   : > { %389 = dma.hbm_to_vmem [thread:$0]  (!%p692_p0), %s737_s16, 128, %s171_s19, %s157_s30  }
  0x4a   : > { %p843_p13 = scmp.ne.s32.totalorder %s842_s7, 0 }
  0x4b   : > { %s764_s15 = sand.u32 (!%p843_p13), 1, %s574_s10   ;;  %p844_p5 = scmp.ne.s32.totalorder (!%p843_p13), %s836_s21, 0 }
  0x4c   : > { %179 = sbr.rel (%p843_p13) target bundleno = 112 (0x70), region = 28  ;;  %s366_s18 = sshll.u32 (!%p843_p13), %s764_s15, 3 }
  0x4d   : > { %s182_s4 = scalar_lea.sflag (!%p843_p13), [#allocation3], %s764_s15  ;;  %s185_s6 = scalar_lea.vmem (!%p843_p13), [#allocation2], %s366_s18 }
  0x53   : > { %557 = dma.done.wait (%p844_p5), %s182_s4, 128  }
  0x54   : > { %559 = vsyncadd (%p844_p5), %s182_s4, 4294967168  ;;  %s191_s5 = scalar_lea.sflag [#allocation6], %s764_s15  ;;  %s194_s16 = scalar_lea.vmem [#allocation5], %s366_s18 }
  0x55   : > { %561 = dma.done.wait (%p844_p5), %s191_s5, 128  }
  0x56   : > { %563 = vsyncadd (%p844_p5), %s191_s5, 4294967168  ;;  %v223_v0 = vld [vmem:[%s185_s6] sm:$0xff]  ;;  %v224_v1 = vld [vmem:[%s194_s16] sm:$0xff]  ;;  %s219_s7 = scalar_lea.vmem [#allocation7], %s366_s18  ;;  %s376_s30 = sshll.u32 %s582_s12, 7 }
  0x57   : > { %s245_s19 = sshll.u32 %s219_s7, 4  ;;  %v225_v2 = vsub.f32 %v223_v0, %v224_v1  ;;  %s783_s21 = scalar_lea.hbm %s832_s2, %s376_s30  ;;  %s778_s19 = int_to_ptr.vmem [resolvable:$true] %s245_s19 }
  0x58   : > { %s229_s28 = scalar_lea.sflag [#allocation4], %s764_s15  ;;  %s504_s29 = scalar_lea.vmem %s778_s19, 128 }
  0x59   : > { %v226_v3 = vand.u32 2147483647, %v225_v2  ;;  %p505_p8 = scmp.ne.s32.totalorder %s778_s19, %s504_s29  ;;  %p845_p0 = scmp.ne.s32.totalorder %s837_s22, 0 }
  0x5a   : > { %s594_s12 = smov [#allocation7]  }
  0x5b   : > { %227 = vst [vmem:[%s219_s7] sm:$0xff] %v226_v3  ;;  %p506_p7 = pnand %p505_p8, %p845_p0  ;;  %s508_s25 = sshll.u32 %s594_s12, 4  ;;  %s509_s25 = int_to_ptr.vmem [resolvable:$false] %s508_s25 }
  0x5c   : > { %s510_s26 = scalar_lea.vmem %s509_s25, 256  ;;  %p511_p10 = scmp.lt.s32.totalorder %s778_s19, %s509_s25 }
  0x5d   : > { %p507_p4 = pneg %p506_p7  ;;  %p512_p12 = scmp.lt.s32.totalorder %s510_s26, %s504_s29 }
  0x5f   : > { %p513_p1 = por %p512_p12, %p511_p10 }
  0x61   : > { %p514_p2 = pnand %p513_p1, %p507_p4 }
  0x63   : > { %517 = shalt.err (!%p514_p2)
}
  0x64   : > { %s518_s3 = scalar_lea.hbm %s783_s21, 128  ;;  %s522_s18 = scalar_lea.hbm %s832_s2, 256 }
  0x65   : > { %p519_p9 = scmp.ne.s32.totalorder %s783_s21, %s518_s3  ;;  %p523_p6 = scmp.lt.u32.totalorder %s783_s21, %s832_s2 }
  0x66   : > { %p524_p13 = scmp.lt.u32.totalorder %s522_s18, %s518_s3  ;;  %p526_p8 = scmp.lt.u32.totalorder %s518_s3, %s783_s21 }
  0x67   : > { %p520_p11 = pnand %p519_p9, %p845_p0 }
  0x68   : > { %p525_p5 = por %p524_p13, %p523_p6 }
  0x69   : > { %p521_p3 = pneg %p520_p11 }
  0x6a   : > { %p527_p7 = por %p526_p8, %p525_p5 }
  0x6c   : > { %p528_p4 = pnand %p527_p7, %p521_p3 }
  0x6e   : > { %531 = shalt.err (!%p528_p4)
}
  0x6f   : > { %381 = dma.vmem_to_hbm [thread:$0]  (%p845_p0), %s778_s19, 128, %s783_s21, %s229_s28  }
  0x70 PF: > { %s257_s5 = sand.u32 1, %s570_s9   ;;  %p846_p10 = scmp.ne.s32.totalorder %s838_s24, 0 }
  0x71   : > { %p847_p12 = scmp.ge.s32.totalorder %s590_s14, 2  ;;  %s258_s16 = scalar_lea.sflag [#allocation4], %s257_s5 }
  0x73   : > { %p391_p1 = pnand %p847_p12, %p846_p10 }
  0x75   : > { %565 = dma.done.wait (!%p391_p1), %s258_s16, 128  }
  0x76   : > { %567 = vsyncadd (!%p391_p1), %s258_s16, 4294967168  ;;  %s21_s14 = sadd.s32 1, %s590_s14   ;;  %s848_s9 = smov %s574_s10 }
  0x77   : > { %p18_p2 = scmp.ge.s32.totalorder %s21_s14, 4   ;;  %s849_s10 = smov %s578_s11 }
  0x78   : > { %s850_s11 = smov %s666_s23  ;;  %s851_s12 = smov %s586_s13 }
  0x79   : > { %s852_s13 = smov %s854_s17  ;;  %20 = sbr.rel (!%p18_p2) target bundleno = 8 (0x8), region = 86 }
  0x80   :  { %263 = vsyncpa [#allocation3], 1 }
  0x81   :  { %265 = vsyncpa [#allocation3 + $0x1], 1 }
  0x82   :  { %266 = vsyncpa [#allocation6], 1 }
  0x83   :  { %268 = vsyncpa [#allocation6 + $0x1], 1 }
  0x84   :  { %269 = vsyncpa [#allocation4], 1 }
  0x85   :  { %271 = vsyncpa [#allocation4 + $0x1], 1 }

</bundles_post_ra>
